<compile_context>
chip_gen: v5e
topology: v5e:2x2
jax: 0.10.0
libtpu: 0.0.40
codegen_flags: <defaults>
</compile_context>

<pallas_src>
import math

import jax
import jax.numpy as jnp
from jax.experimental import pallas as pl
from jax.experimental.pallas import tpu as pltpu


# ----------------------------- parameter init -------------------------------
def init_params(key, dims):
    """Xavier-uniform (gain=sqrt(2) == calculate_gain('relu')), zero bias —
    matches get_and_init_FC_layer.  Weights kept in native nn.Linear layout
    (dout, din); biases stored as (dout, 1) columns for the feature-major
    kernel."""
    params = []
    gain = math.sqrt(2.0)
    for i in range(1, len(dims)):
        din, dout = dims[i - 1], dims[i]
        key, sub = jax.random.split(key)
        bound = gain * math.sqrt(6.0 / (din + dout))
        w = jax.random.uniform(sub, (dout, din), jnp.float32, -bound, bound)
        b = jnp.zeros((dout, 1), jnp.float32)
        params.append((w, b))
    return params


# --------------------------------- kernel -----------------------------------
def _make_mlp_kernel(n_layers):
    def kernel(*refs):
        # refs = (x_ref, w0, b0, w1, b1, ..., o_ref)
        # x_ref is (din, tm): features on sublanes, points on lanes.
        x_ref = refs[0]
        o_ref = refs[-1]
        h = x_ref[...].astype(jnp.float32)                    # (din, tm)
        for l in range(n_layers):
            w = refs[1 + 2 * l][...].astype(jnp.float32)      # (dout, din)
            b = refs[2 + 2 * l][...].astype(jnp.float32)      # (dout, 1)
            h = jnp.dot(w, h, preferred_element_type=jnp.float32) + b
            if l != n_layers - 1:                             # doLastRelu=False
                h = jnp.maximum(h, 0.0)
        o_ref[...] = h.astype(o_ref.dtype)

    return kernel


def _round_up(a, b):
    return ((a + b - 1) // b) * b


def folding_net_single(x, params, *, tm=2048):
    """x: (..., din) -> (..., dout).  Hot path (matmuls + ReLU) runs in Pallas."""
    dims_in = x.shape[-1]
    lead = x.shape[:-1]
    M = math.prod(lead) if lead else 1

    n_layers = len(params)
    dout = params[-1][0].shape[0]

    # ---- choose the point tile: as large as possible, >= 2 tiles if we can ----
    M_aligned = _round_up(M, 128)
    tm_eff = min(tm, M_aligned)
    n_tiles = pl.cdiv(M_aligned, tm_eff)
    if n_tiles == 1 and M_aligned >= 256:
        # keep >= 2 tiles so the "parallel" axis can shard over v7x's 2 TCs
        tm_eff = _round_up(M_aligned // 2, 128)
        n_tiles = 2
    M_pad = n_tiles * tm_eff

    # ---- feature-major layout + zero-pad the point axis ----
    x2 = x.reshape(M, dims_in)
    xT = jnp.pad(x2.T, ((0, 0), (0, M_pad - M)))              # (din, M_pad)

    in_specs = [pl.BlockSpec((dims_in, tm_eff), lambda i: (0, i))]
    flat_args = [xT]
    for (w, b) in params:
        # Weights/biases: grid-invariant full-array blocks.
        # TODO(synk): for real FoldingNet dims (~512) single-buffer these
        # (pipeline_mode=pl.Buffered(1)) and set vmem_limit_bytes so the
        # budget also fits v7x's 64 MiB VMEM.
        in_specs.append(pl.BlockSpec(w.shape, lambda i: (0, 0)))
        in_specs.append(pl.BlockSpec(b.shape, lambda i: (0, 0)))
        flat_args += [w, b]

    out_spec = pl.BlockSpec((dout, tm_eff), lambda i: (0, i))

    out = pl.pallas_call(
        _make_mlp_kernel(n_layers),
        out_shape=jax.ShapeDtypeStruct((dout, M_pad), x.dtype),
        grid_spec=pltpu.PrefetchScalarGridSpec(
            num_scalar_prefetch=0,
            grid=(n_tiles,),
            in_specs=in_specs,
            out_specs=out_spec,
        ),
        compiler_params=pltpu.CompilerParams(
            dimension_semantics=("parallel",),
        ),
    )(*flat_args)

    return out[:, :M].T.reshape(*lead, dout)


# ------------------------------ pure-JAX ref ---------------------------------
def folding_net_single_ref(x, params):
    h = x.astype(jnp.float32)
    for l, (w, b) in enumerate(params):
        h = h @ w.T + b[:, 0]
        if l != len(params) - 1:
            h = jnp.maximum(h, 0.0)
    return h.astype(x.dtype)


# ----------------------------------- main ------------------------------------
if __name__ == "__main__":
    key = jax.random.PRNGKey(0)
    k_x1, k_x2, k_p = jax.random.split(key, 3)

    # FoldingNetSingle(dims) — small synthetic dims: din=16 -> 32 -> 32 -> 8
    dims = (16, 32, 32, 8)
    params = init_params(k_p, dims)

    # Case 1: B*N = 128 points (exact 128 multiple).
    x1 = jax.random.normal(k_x1, (2, 64, dims[0]), jnp.float32)
    y1 = jax.block_until_ready(folding_net_single(x1, params))
    y1_ref = folding_net_single_ref(x1, params)
    assert y1.shape == (2, 64, dims[-1])
    assert jnp.allclose(y1, y1_ref, atol=1e-4, rtol=1e-4), "mismatch vs reference (case 1)"

    # Case 2: B*N = 135 points (exercises padding + 2-tile split).
    x2 = jax.random.normal(k_x2, (3, 45, dims[0]), jnp.float32)
    y2 = jax.block_until_ready(folding_net_single(x2, params))
    y2_ref = folding_net_single_ref(x2, params)
    assert y2.shape == (3, 45, dims[-1])
    assert jnp.allclose(y2, y2_ref, atol=1e-4, rtol=1e-4), "mismatch vs reference (case 2)"

    print("KERNEL_OK")
</pallas_src>

<mosaic_0001>
module attributes {stable_mosaic.version = 11 : i64} {
  func.func @kernel(%arg0: i32, %arg1: memref<16x128xf32, #tpu.memory_space<vmem>>, %arg2: memref<32x16xf32, #tpu.memory_space<vmem>>, %arg3: memref<32x1xf32, #tpu.memory_space<vmem>>, %arg4: memref<32x32xf32, #tpu.memory_space<vmem>>, %arg5: memref<32x1xf32, #tpu.memory_space<vmem>>, %arg6: memref<8x32xf32, #tpu.memory_space<vmem>>, %arg7: memref<8x1xf32, #tpu.memory_space<vmem>>, %arg8: memref<8x128xf32, #tpu.memory_space<vmem>>) attributes {dimension_semantics = [#tpu.dimension_semantics<parallel>], iteration_bounds = array<i64: 1>, scalar_prefetch = 0 : i64, scratch_operands = 0 : i64, tpu.core_type = #tpu.core_type<tc>, window_params = [{transform_indices = @transform_0, window_bounds = array<i64: 16, 128>}, {pipeline_mode = #tpu.pipeline_mode<synchronous>, transform_indices = @transform_1, window_bounds = array<i64: 32, 16>}, {pipeline_mode = #tpu.pipeline_mode<synchronous>, transform_indices = @transform_2, window_bounds = array<i64: 32, 1>}, {pipeline_mode = #tpu.pipeline_mode<synchronous>, transform_indices = @transform_3, window_bounds = array<i64: 32, 32>}, {pipeline_mode = #tpu.pipeline_mode<synchronous>, transform_indices = @transform_4, window_bounds = array<i64: 32, 1>}, {pipeline_mode = #tpu.pipeline_mode<synchronous>, transform_indices = @transform_5, window_bounds = array<i64: 8, 32>}, {pipeline_mode = #tpu.pipeline_mode<synchronous>, transform_indices = @transform_6, window_bounds = array<i64: 8, 1>}, {transform_indices = @transform_7, window_bounds = array<i64: 8, 128>}]} {
    %c0 = arith.constant 0 : index
    %c0_0 = arith.constant 0 : index
    %0 = vector.load %arg1[%c0, %c0_0] : memref<16x128xf32, #tpu.memory_space<vmem>>, vector<16x128xf32>
    %c0_1 = arith.constant 0 : index
    %c0_2 = arith.constant 0 : index
    %1 = vector.load %arg2[%c0_1, %c0_2] : memref<32x16xf32, #tpu.memory_space<vmem>>, vector<32x16xf32>
    %c0_3 = arith.constant 0 : index
    %c0_4 = arith.constant 0 : index
    %2 = vector.load %arg3[%c0_3, %c0_4] : memref<32x1xf32, #tpu.memory_space<vmem>>, vector<32x1xf32>
    %cst = arith.constant dense<0.000000e+00> : vector<32x128xf32>
    %3 = tpu.matmul %1, %0, %cst {dimension_numbers = #tpu.dot_dimension_numbers<[1], [0], [0], [1], [0, 0, 1, 1], [], []>} : vector<32x16xf32>, vector<16x128xf32>, vector<32x128xf32> -> vector<32x128xf32>
    %4 = vector.broadcast %2 : vector<32x1xf32> to vector<32x128xf32>
    %5 = arith.addf %3, %4 : vector<32x128xf32>
    %cst_5 = arith.constant 0.000000e+00 : f32
    %6 = vector.broadcast %cst_5 : f32 to vector<32x128xf32>
    %7 = arith.maximumf %5, %6 : vector<32x128xf32>
    %c0_6 = arith.constant 0 : index
    %c0_7 = arith.constant 0 : index
    %8 = vector.load %arg4[%c0_6, %c0_7] : memref<32x32xf32, #tpu.memory_space<vmem>>, vector<32x32xf32>
    %c0_8 = arith.constant 0 : index
    %c0_9 = arith.constant 0 : index
    %9 = vector.load %arg5[%c0_8, %c0_9] : memref<32x1xf32, #tpu.memory_space<vmem>>, vector<32x1xf32>
    %cst_10 = arith.constant dense<0.000000e+00> : vector<32x128xf32>
    %10 = tpu.matmul %8, %7, %cst_10 {dimension_numbers = #tpu.dot_dimension_numbers<[1], [0], [0], [1], [0, 0, 1, 1], [], []>} : vector<32x32xf32>, vector<32x128xf32>, vector<32x128xf32> -> vector<32x128xf32>
    %11 = vector.broadcast %9 : vector<32x1xf32> to vector<32x128xf32>
    %12 = arith.addf %10, %11 : vector<32x128xf32>
    %cst_11 = arith.constant 0.000000e+00 : f32
    %13 = vector.broadcast %cst_11 : f32 to vector<32x128xf32>
    %14 = arith.maximumf %12, %13 : vector<32x128xf32>
    %c0_12 = arith.constant 0 : index
    %c0_13 = arith.constant 0 : index
    %15 = vector.load %arg6[%c0_12, %c0_13] : memref<8x32xf32, #tpu.memory_space<vmem>>, vector<8x32xf32>
    %c0_14 = arith.constant 0 : index
    %c0_15 = arith.constant 0 : index
    %16 = vector.load %arg7[%c0_14, %c0_15] : memref<8x1xf32, #tpu.memory_space<vmem>>, vector<8x1xf32>
    %cst_16 = arith.constant dense<0.000000e+00> : vector<8x128xf32>
    %17 = tpu.matmul %15, %14, %cst_16 {dimension_numbers = #tpu.dot_dimension_numbers<[1], [0], [0], [1], [0, 0, 1, 1], [], []>} : vector<8x32xf32>, vector<32x128xf32>, vector<8x128xf32> -> vector<8x128xf32>
    %18 = vector.broadcast %16 : vector<8x1xf32> to vector<8x128xf32>
    %19 = arith.addf %17, %18 : vector<8x128xf32>
    %c0_17 = arith.constant 0 : index
    %c0_18 = arith.constant 0 : index
    %20 = vector.load %arg8[%c0_17, %c0_18] : memref<8x128xf32, #tpu.memory_space<vmem>>, vector<8x128xf32>
    tpu.vector_store %arg8[%c0_17, %c0_18], %19 {strides = array<i32>} : memref<8x128xf32, #tpu.memory_space<vmem>>, vector<8x128xf32>,
    return
  }
  func.func @transform_0(%arg0: i32) -> (i32, i32) {
    %c0_i32 = arith.constant 0 : i32
    %c0_i32_0 = arith.constant 0 : i32
    return %c0_i32, %arg0 : i32, i32
  }
  func.func @transform_1(%arg0: i32) -> (i32, i32) {
    %c0_i32 = arith.constant 0 : i32
    %c0_i32_0 = arith.constant 0 : i32
    %c0_i32_1 = arith.constant 0 : i32
    return %c0_i32, %c0_i32_0 : i32, i32
  }
  func.func @transform_2(%arg0: i32) -> (i32, i32) {
    %c0_i32 = arith.constant 0 : i32
    %c0_i32_0 = arith.constant 0 : i32
    %c0_i32_1 = arith.constant 0 : i32
    return %c0_i32, %c0_i32_0 : i32, i32
  }
  func.func @transform_3(%arg0: i32) -> (i32, i32) {
    %c0_i32 = arith.constant 0 : i32
    %c0_i32_0 = arith.constant 0 : i32
    %c0_i32_1 = arith.constant 0 : i32
    return %c0_i32, %c0_i32_0 : i32, i32
  }
  func.func @transform_4(%arg0: i32) -> (i32, i32) {
    %c0_i32 = arith.constant 0 : i32
    %c0_i32_0 = arith.constant 0 : i32
    %c0_i32_1 = arith.constant 0 : i32
    return %c0_i32, %c0_i32_0 : i32, i32
  }
  func.func @transform_5(%arg0: i32) -> (i32, i32) {
    %c0_i32 = arith.constant 0 : i32
    %c0_i32_0 = arith.constant 0 : i32
    %c0_i32_1 = arith.constant 0 : i32
    return %c0_i32, %c0_i32_0 : i32, i32
  }
  func.func @transform_6(%arg0: i32) -> (i32, i32) {
    %c0_i32 = arith.constant 0 : i32
    %c0_i32_0 = arith.constant 0 : i32
    %c0_i32_1 = arith.constant 0 : i32
    return %c0_i32, %c0_i32_0 : i32, i32
  }
  func.func @transform_7(%arg0: i32) -> (i32, i32) {
    %c0_i32 = arith.constant 0 : i32
    %c0_i32_0 = arith.constant 0 : i32
    return %c0_i32, %arg0 : i32, i32
  }
}

</mosaic_0001>

<bundles_post_ra>
// kernel: tpu_custom_call.1
= control target key start
LH: loop header
LB: loop body
LE: loop exit
PB: predicated region body
PF: predicated region fallthrough
CT: control target
= control target key end

     0   :  { %vm57_vm0 = vcmask 130048   ;;  %v274_v3 = vmov 0   ;;  %s388_s0 = inlined_call_operand.vmem [shape: f32[16,128], index: 0, kind: input, shape index: {}]   ;;  %s389_s1 = inlined_call_operand.vmem [shape: f32[32,16], index: 1, kind: input, shape index: {}]   ;;  %s390_s2 = inlined_call_operand.vmem [shape: f32[32,1], index: 2, kind: input, shape index: {}]   ;;  %s391_s3 = inlined_call_operand.vmem [shape: f32[32,32], index: 3, kind: input, shape index: {}]   ;;  %s392_s4 = inlined_call_operand.vmem [shape: f32[32,1], index: 4, kind: input, shape index: {}]   ;;  %s393_s5 = inlined_call_operand.vmem [shape: f32[8,32], index: 5, kind: input, shape index: {}]   ;;  %s394_s6 = inlined_call_operand.vmem [shape: f32[8,1], index: 6, kind: input, shape index: {}]   ;;  %s395_s7 = inlined_call_operand.hbm [shape: f32[8,128], index: 7, kind: output, shape index: {}]  }
   0x1   :  { %v28_v0 = vld [vmem:[%s388_s0 + $0x8] sm:$0xff]  ;;  %v27_v1 = vld [vmem:[%s388_s0] sm:$0xff]  ;;  %246 = vset.pattern.permute.xlu1 %v274_v3  ;;  %v36_v4 = vld [vmem:[%s390_s2 + $0x18] sm:$0xff]  ;;  %245 = vset.pattern.permute.xlu0 %v274_v3 }
   0x2   :  { %84 = vmatpush.msra.mxu0 %v28_v0  ;;  %v29_v2 = vld [vmem:[%s389_s1] sm:$0xff]  ;;  %v34_v5 = vld [vmem:[%s390_s2 + $0x8] sm:$0xff]  ;;  %54 = vperm.xlu0 %245, %v36_v4   ;;  %v32_v6 = vld [vmem:[%s389_s1 + $0x18] sm:$0xff] }
   0x3   :  { %44 = vperm.xlu1 %246, %v34_v5   ;;  %233 = vmatpush.msra.mxu1 %v28_v0 }
   0x4   :  { %85 = vmatpush.msra.mxu0 %v27_v1 }
   0x5   :  { %224 = vmatmul.msk.f32.vlgmr.msra.gmra.mxu0 %vm57_vm0, %v29_v2 }
   0x6   :  { %12 = vsyncpa [#allocation3], 0  ;;  %247 = vset.pattern.permute.xlu2 %v274_v3  ;;  %234 = vmatpush.msra.mxu1 %v27_v1  ;;  %v33_v7 = vld [vmem:[%s390_s2] sm:$0xff]  ;;  %v35_v8 = vld [vmem:[%s390_s2 + $0x10] sm:$0xff]  ;;  %vm131_vm1 = vcmask 261120   ;;  %s275_s11 = smov [#allocation2]  }
   0x7   :  { %227 = vmatmul.msk.f32.vlgmr.msra.gmra.mxu1 %vm57_vm0, %v32_v6  ;;  %v30_v9 = vld [vmem:[%s389_s1 + $0x8] sm:$0xff]  ;;  %v107_v10 = vld [vmem:[%s392_s4] sm:$0xff]  ;;  %v31_v12 = vld [vmem:[%s389_s1 + $0x10] sm:$0xff]  ;;  %s213_s12 = sshll.u32 %s275_s11, 4  ;;  %s215_s15 = sshll.u32 %s395_s7, 4  ;;  %s214_s12 = int_to_ptr.vmem [resolvable:$true] %s213_s12  ;;  %s216_s15 = int_to_ptr.hbm [resolvable:$true] %s215_s15 }
   0x8   :  { %v108_v11 = vld [vmem:[%s392_s4 + $0x8] sm:$0xff]  ;;  %v110_v16 = vld [vmem:[%s392_s4 + $0x18] sm:$0xff]  ;;  %v109_v21 = vld [vmem:[%s392_s4 + $0x10] sm:$0xff] }
   0x9   :  { %128 = vperm.xlu2 %247, %v110_v16   ;;  %v178_v27 = vld [vmem:[%s394_s6] sm:$0xff]  ;;  %v104_v33 = vld [vmem:[%s391_s3 + $0x8] sm:$0xff]  ;;  %v105_v34 = vld [vmem:[%s391_s3 + $0x10] sm:$0xff] }
   0xa   :  { %49 = vperm.xlu0 %245, %v35_v8   ;;  %v103_v32 = vld [vmem:[%s391_s3] sm:$0xff]  ;;  %v106_v35 = vld [vmem:[%s391_s3 + $0x18] sm:$0xff] }
   0xb   :  { %39 = vperm.xlu1 %246, %v33_v7   ;;  %v177_v52 = vld [vmem:[%s393_s5] sm:$0xff] }
   0xd   :  { %225 = vmatmul.msk.f32.gmra.mxu0 %vm57_vm0, %v30_v9 }
  0x11   :  { %123 = vperm.xlu2 %247, %v109_v21  }
  0x12   :  { %118 = vperm.xlu0 %245, %v108_v11  }
  0x13   :  { %113 = vperm.xlu1 %246, %v107_v10  }
  0x15   :  { %226 = vmatmul.msk.f32.gmra.mxu0 %vm57_vm0, %v31_v12 }
  0x19   :  { %181 = vperm.xlu2 %247, %v178_v27  }
  0x63   :  { %v129_v36 = vpop.permute.xlu2 %128 }
  0x6b   :  { %v124_v38 = vpop.permute.xlu2 %123 }
  0x73   :  { %v182_v53 = vpop.permute.xlu2 %181 }
  0x74   :  { %v55_v14 = vpop.permute.xlu0 %54 }
  0x75   :  { %v45_v18 = vpop.permute.xlu1 %44 }
  0x7c   :  { %v50_v23 = vpop.permute.xlu0 %49 }
  0x7d   :  { %v40_v22 = vpop.permute.xlu1 %39 }
  0x82   :  { %v87_v13 = vpop.f32.mrf.mxu0 }
  0x83   :  { %v88_v28 = vadd.f32 %v87_v13, %v40_v22 }
  0x84   :  { %v96_v15 = vpop.f32.mrf.mxu1  ;;  %v119_v43 = vpop.permute.xlu0 %118 }
  0x85   :  { %v97_v17 = vadd.f32 %v96_v15, %v55_v14  ;;  %v99_v31 = vmax.f32 %v88_v28, 0.0  ;;  %v114_v47 = vpop.permute.xlu1 %113 }
  0x87   :  { %v102_v19 = vmax.f32 %v97_v17, 0.0 }
  0x89   :  { %156 = vmatpush.msrb.mxu1 %v102_v19  ;;  %235 = vmatpush.msra.mxu2 %v102_v19 }
  0x8a   :  { %v90_v20 = vpop.f32.mrf.mxu0  ;;  %236 = vmatpush.msra.mxu3 %v102_v19 }
  0x8b   :  { %v91_v25 = vadd.f32 %v90_v20, %v45_v18 }
  0x8d   :  { %v100_v30 = vmax.f32 %v91_v25, 0.0 }
  0x92   :  { %v93_v24 = vpop.f32.mrf.mxu0 }
  0x93   :  { %v94_v26 = vadd.f32 %v93_v24, %v50_v23 }
  0x95   :  { %v101_v29 = vmax.f32 %v94_v26, 0.0 }
  0x97   :  { %157 = vmatpush.msrb.mxu1 %v101_v29  ;;  %237 = vmatpush.msra.mxu2 %v101_v29 }
  0x98   :  { %238 = vmatpush.msra.mxu3 %v101_v29 }
  0x99   :  { %158 = vmatpush.msrb.mxu1 %v100_v30  ;;  %239 = vmatpush.msra.mxu2 %v100_v30 }
  0x9a   :  { %240 = vmatpush.msra.mxu3 %v100_v30 }
  0x9b   :  { %159 = vmatpush.msrb.mxu1 %v99_v31  ;;  %241 = vmatpush.msra.mxu2 %v99_v31 }
  0x9c   :  { %242 = vmatpush.msra.mxu3 %v99_v31  ;;  %228 = vmatmul.msk.f32.vlgmr.msrb.gmra.mxu1 %vm131_vm1, %v103_v32 }
  0x9d   :  { %229 = vmatmul.msk.f32.vlgmr.msra.gmra.mxu2 %vm131_vm1, %v104_v33  ;;  %230 = vmatmul.msk.f32.vlgmr.msra.gmra.mxu3 %vm131_vm1, %v105_v34 }
  0xa5   :  { %231 = vmatmul.msk.f32.gmra.mxu3 %vm131_vm1, %v106_v35 }
 0x119   :  { %v161_v44 = vpop.f32.mrf.mxu1 }
 0x11a   :  { %v162_v48 = vadd.f32 %v161_v44, %v114_v47 }
 0x11c   :  { %v173_v51 = vmax.f32 %v162_v48, 0.0 }
 0x120   :  { %v167_v37 = vpop.f32.mrf.mxu3  ;;  %v164_v39 = vpop.f32.mrf.mxu2 }
 0x121   :  { %v168_v41 = vadd.f32 %v167_v37, %v124_v38  ;;  %v165_v45 = vadd.f32 %v164_v39, %v119_v43 }
 0x123   :  { %v175_v49 = vmax.f32 %v168_v41, 0.0  ;;  %v174_v50 = vmax.f32 %v165_v45, 0.0 }
 0x128   :  { %v170_v40 = vpop.f32.mrf.mxu3 }
 0x129   :  { %v171_v42 = vadd.f32 %v170_v40, %v129_v36 }
 0x12b   :  { %v176_v46 = vmax.f32 %v171_v42, 0.0 }
 0x12d   :  { %199 = vmatpush.msrb.mxu2 %v176_v46 }
 0x12f   :  { %200 = vmatpush.msrb.mxu2 %v175_v49 }
 0x131   :  { %201 = vmatpush.msrb.mxu2 %v174_v50 }
 0x133   :  { %202 = vmatpush.msrb.mxu2 %v173_v51 }
 0x134   :  { %232 = vmatmul.msk.f32.vlgmr.msrb.gmra.mxu2 %vm131_vm1, %v177_v52 }
 0x1b7   :  { %v204_v54 = vpop.f32.mrf.mxu2 }
 0x1b8   :  { %v205_v55 = vadd.f32 %v204_v54, %v182_v53 }
 0x1ba   :  { %207 = vst [vmem:[#allocation2] sm:$0xff] %v205_v55 }
 0x1bb   :  { %218 = dma.vmem_to_hbm [thread:$0]  %s214_s12, 128, %s216_s15, [#allocation3]  }
 0x1bc   :  { %272 = dma.done.wait [#allocation3], 128  }
 0x1bd   :  { %273 = vsyncadd [#allocation3], 4294967168 }
 0x1be   :  { %223 = vsyncpa [#allocation3], 1 }

</bundles_post_ra>
